<compile_context>
chip_gen: v6e
topology: v6e:2x2x1
jax: 0.10.0
libtpu: 0.0.40
codegen_flags: <defaults>
</compile_context>

<pallas_src>
import functools

import jax
import jax.numpy as jnp
from jax.experimental import pallas as pl
from jax.experimental.pallas import tpu as pltpu


_TARGET_BLOCK_BYTES = 4 * 1024 * 1024    # per input block (Pallas double-buffers it)
_VMEM_LIMIT_BYTES = 32 * 1024 * 1024     # fits v5e/v6e (128 MiB) and v7x (64 MiB) physical VMEM


def _choose_tiling(nc, hw, itemsize, target_bytes):
    """Pick (row_tile, hw_tile) so one padded (row_tile, hw_tile) VMEM block is ~target bytes."""
    # Account for lane padding of the last dim to a multiple of 128 when budgeting VMEM.
    padded_row_bytes = ((hw + 127) // 128) * 128 * itemsize
    if 8 * padded_row_bytes <= target_bytes:
        # Whole spatial extent per chunk; stack as many rows as the budget allows.
        hw_tile = hw
        row_tile = max(8, (target_bytes // padded_row_bytes) // 8 * 8)
    else:
        # Very large images: chunk the flattened spatial axis in 128-lane multiples.
        row_tile = 8
        hw_tile = max(128, (target_bytes // (row_tile * itemsize)) // 128 * 128)
        if hw_tile >= hw:
            hw_tile = hw
    row_tile = min(row_tile, nc)
    return row_tile, hw_tile


def _concat_pool_kernel(x_ref, max_ref, avg_ref, max_acc, sum_acc, *, hw_total, hw_tile):
    # x_ref: (row_tile, hw_tile) chunk of flattened (N*C, H*W) rows.
    # max_ref / avg_ref: (row_tile, 1), resident across spatial chunks.
    k = pl.program_id(1)

    x = x_ref[...].astype(jnp.float32)                 # single upcast; kernel is mem-bound

    if hw_total % hw_tile != 0:
        # Mask the spatial padding of the final chunk.
        pos = k * hw_tile + jax.lax.broadcasted_iota(jnp.int32, x.shape, 1)
        valid = pos < hw_total
        x_max = jnp.where(valid, x, -jnp.inf)
        x_sum = jnp.where(valid, x, 0.0)
    else:
        x_max = x
        x_sum = x

    chunk_max = jnp.max(x_max, axis=-1, keepdims=True)  # (row_tile, 1)
    chunk_sum = jnp.sum(x_sum, axis=-1, keepdims=True)  # (row_tile, 1), f32 accumulation

    @pl.when(k == 0)
    def _():
        max_acc[...] = jnp.full(max_acc.shape, -jnp.inf, max_acc.dtype)
        sum_acc[...] = jnp.zeros_like(sum_acc)

    max_acc[...] = jnp.maximum(max_acc[...], chunk_max)
    sum_acc[...] = sum_acc[...] + chunk_sum

    @pl.when(k == pl.num_programs(1) - 1)
    def _():
        max_ref[...] = max_acc[...].astype(max_ref.dtype)
        avg_ref[...] = (sum_acc[...] * (1.0 / hw_total)).astype(avg_ref.dtype)


def adaptive_concat_pool2d(x, *, target_block_bytes=_TARGET_BLOCK_BYTES):
    """x: (N, C, H, W) -> (N, 2*C, 1, 1). Equivalent to AdaptiveConcatPool2d(sz=None)."""
    # TODO(synk): general output_size > 1 (adaptive windowing) not implemented; the module
    # default (sz=None -> global 1x1 pooling) is what is reproduced here.
    N, C, H, W = x.shape
    HW = H * W
    NC = N * C
    itemsize = jnp.dtype(x.dtype).itemsize
    row_tile, hw_tile = _choose_tiling(NC, HW, itemsize, target_block_bytes)

    xr = x.reshape(NC, HW)
    kernel = functools.partial(_concat_ool_kernel := _concat_pool_kernel,
                               hw_total=HW, hw_tile=hw_tile)

    grid = (pl.cdiv(NC, row_tile), pl.cdiv(HW, hw_tile))

    cost = pl.CostEstimate(
        flops=2 * NC * HW,                                   # one max-cmp + one add per element
        transcendentals=0,
        bytes_accessed=NC * HW * itemsize + 2 * NC * itemsize,
    )

    mx, av = pl.pallas_call(
        kernel,
        out_shape=(jax.ShapeDtypeStruct((NC, 1), x.dtype),
                   jax.ShapeDtypeStruct((NC, 1), x.dtype)),
        grid=grid,
        in_specs=[pl.BlockSpec((row_tile, hw_tile), lambda i, k: (i, k))],
        out_specs=(pl.BlockSpec((row_tile, 1), lambda i, k: (i, 0)),
                   pl.BlockSpec((row_tile, 1), lambda i, k: (i, 0))),
        scratch_shapes=[
            pltpu.VMEM((row_tile, 1), jnp.float32),          # running max
            pltpu.VMEM((row_tile, 1), jnp.float32),          # running sum
        ],
        compiler_params=pltpu.CompilerParams(
            dimension_semantics=("parallel", "arbitrary"),
            vmem_limit_bytes=_VMEM_LIMIT_BYTES,
        ),
        cost_estimate=cost,
    )(xr)

    # fastai ordering: max-pooled channels first, then avg-pooled.
    out = jnp.concatenate([mx.reshape(N, C), av.reshape(N, C)], axis=1)
    return out.reshape(N, 2 * C, 1, 1)


def _reference(x):
    xf = x.astype(jnp.float32)
    ref_max = jnp.max(xf, axis=(2, 3), keepdims=True)
    ref_avg = jnp.mean(xf, axis=(2, 3), keepdims=True)
    return jnp.concatenate([ref_max, ref_avg], axis=1)


if __name__ == "__main__":
    key = jax.random.PRNGKey(0)

    # Test 1: module-default small shape (single row-tile / single spatial-chunk path).
    x = jax.random.normal(key, (2, 4, 16, 16), dtype=jnp.float32)
    y = adaptive_concat_pool2d(x)
    jax.block_until_ready(y)
    assert y.shape == (2, 8, 1, 1), y.shape
    assert jnp.allclose(y, _reference(x), atol=1e-5, rtol=1e-5), "mismatch vs reference (test 1)"

    # Test 2: force the multi-row-tile + chunked/masked spatial-reduction path by shrinking
    # the block budget (same code path used for large feature maps).
    x2 = jax.random.normal(jax.random.PRNGKey(1), (4, 8, 16, 20), dtype=jnp.float32)
    y2 = adaptive_concat_pool2d(x2, target_block_bytes=8192)
    jax.block_until_ready(y2)
    assert y2.shape == (4, 16, 1, 1), y2.shape
    assert jnp.allclose(y2, _reference(x2), atol=1e-5, rtol=1e-5), "mismatch vs reference (test 2)"

    # Test 3: bf16 inputs (f32 accumulation inside the kernel, output cast back to bf16).
    x3 = jax.random.normal(jax.random.PRNGKey(2), (2, 16, 14, 14), dtype=jnp.bfloat16)
    y3 = adaptive_concat_pool2d(x3)
    jax.block_until_ready(y3)
    assert y3.shape == (2, 32, 1, 1), y3.shape
    assert jnp.allclose(y3.astype(jnp.float32), _reference(x3), atol=1e-2, rtol=1e-2), \
        "mismatch vs reference (test 3)"

    print("KERNEL_OK")
</pallas_src>

<mosaic_0001>
module attributes {stable_mosaic.version = 11 : i64} {
  func.func @_concat_pool_kernel(%arg0: i32, %arg1: i32, %arg2: memref<8x256xf32, #tpu.memory_space<vmem>>, %arg3: memref<8x1xf32, #tpu.memory_space<vmem>>, %arg4: memref<8x1xf32, #tpu.memory_space<vmem>>, %arg5: memref<8x1xf32, #tpu.memory_space<vmem>>, %arg6: memref<8x1xf32, #tpu.memory_space<vmem>>) attributes {dimension_semantics = [#tpu.dimension_semantics<parallel>, #tpu.dimension_semantics<arbitrary>], iteration_bounds = array<i64: 1, 1>, scalar_prefetch = 0 : i64, scratch_operands = 2 : i64, tpu.core_type = #tpu.core_type<tc>, window_params = [{transform_indices = @transform_0, window_bounds = array<i64: 8, 256>}, {transform_indices = @transform_1, window_bounds = array<i64: 8, 1>}, {transform_indices = @transform_2, window_bounds = array<i64: 8, 1>}]} {
    %c0 = arith.constant 0 : index
    %c0_0 = arith.constant 0 : index
    %0 = vector.load %arg2[%c0, %c0_0] : memref<8x256xf32, #tpu.memory_space<vmem>>, vector<8x256xf32>
    %cst = arith.constant dense<0xFF800000> : vector<8xf32>
    %1 = vector.multi_reduction <maximumf>, %0, %cst [1] : vector<8x256xf32> to vector<8xf32>
    %2 = vector.shape_cast %1 : vector<8xf32> to vector<8x1xf32>
    %cst_1 = arith.constant dense<0.000000e+00> : vector<8xf32>
    %3 = vector.multi_reduction <add>, %0, %cst_1 [1] : vector<8x256xf32> to vector<8xf32>
    %4 = vector.shape_cast %3 : vector<8xf32> to vector<8x1xf32>
    %c0_i32 = arith.constant 0 : i32
    %5 = arith.cmpi eq, %arg1, %c0_i32 : i32
    %6 = arith.extui %5 : i1 to i32
    %c0_i32_2 = arith.constant 0 : i32
    %7 = arith.cmpi ne, %6, %c0_i32_2 : i32
    scf.if %7 {
      %cst_13 = arith.constant 0xFF800000 : f32
      %17 = vector.broadcast %cst_13 : f32 to vector<8x1xf32>
      %c0_14 = arith.constant 0 : index
      %c0_15 = arith.constant 0 : index
      %18 = vector.load %arg5[%c0_14, %c0_15] : memref<8x1xf32, #tpu.memory_space<vmem>>, vector<8x1xf32>
      tpu.vector_store %arg5[%c0_14, %c0_15], %17 {strides = array<i32>} : memref<8x1xf32, #tpu.memory_space<vmem>>, vector<8x1xf32>,
      %cst_16 = arith.constant 0.000000e+00 : f32
      %19 = vector.broadcast %cst_16 : f32 to vector<8x1xf32>
      %c0_17 = arith.constant 0 : index
      %c0_18 = arith.constant 0 : index
      %20 = vector.load %arg6[%c0_17, %c0_18] : memref<8x1xf32, #tpu.memory_space<vmem>>, vector<8x1xf32>
      tpu.vector_store %arg6[%c0_17, %c0_18], %19 {strides = array<i32>} : memref<8x1xf32, #tpu.memory_space<vmem>>, vector<8x1xf32>,
    } else {
    }
    %c0_3 = arith.constant 0 : index
    %c0_4 = arith.constant 0 : index
    %8 = vector.load %arg5[%c0_3, %c0_4] : memref<8x1xf32, #tpu.memory_space<vmem>>, vector<8x1xf32>
    %9 = arith.maximumf %8, %2 : vector<8x1xf32>
    %c0_5 = arith.constant 0 : index
    %c0_6 = arith.constant 0 : index
    %10 = vector.load %arg5[%c0_5, %c0_6] : memref<8x1xf32, #tpu.memory_space<vmem>>, vector<8x1xf32>
    tpu.vector_store %arg5[%c0_5, %c0_6], %9 {strides = array<i32>} : memref<8x1xf32, #tpu.memory_space<vmem>>, vector<8x1xf32>,
    %c0_7 = arith.constant 0 : index
    %c0_8 = arith.constant 0 : index
    %11 = vector.load %arg6[%c0_7, %c0_8] : memref<8x1xf32, #tpu.memory_space<vmem>>, vector<8x1xf32>
    %12 = arith.addf %11, %4 : vector<8x1xf32>
    %c0_9 = arith.constant 0 : index
    %c0_10 = arith.constant 0 : index
    %13 = vector.load %arg6[%c0_9, %c0_10] : memref<8x1xf32, #tpu.memory_space<vmem>>, vector<8x1xf32>
    tpu.vector_store %arg6[%c0_9, %c0_10], %12 {strides = array<i32>} : memref<8x1xf32, #tpu.memory_space<vmem>>, vector<8x1xf32>,
    %c0_i32_11 = arith.constant 0 : i32
    %14 = arith.cmpi eq, %arg1, %c0_i32_11 : i32
    %15 = arith.extui %14 : i1 to i32
    %c0_i32_12 = arith.constant 0 : i32
    %16 = arith.cmpi ne, %15, %c0_i32_12 : i32
    scf.if %16 {
      %c0_13 = arith.constant 0 : index
      %c0_14 = arith.constant 0 : index
      %17 = vector.load %arg5[%c0_13, %c0_14] : memref<8x1xf32, #tpu.memory_space<vmem>>, vector<8x1xf32>
      %c0_15 = arith.constant 0 : index
      %c0_16 = arith.constant 0 : index
      %18 = vector.load %arg3[%c0_15, %c0_16] : memref<8x1xf32, #tpu.memory_space<vmem>>, vector<8x1xf32>
      tpu.vector_store %arg3[%c0_15, %c0_16], %17 {strides = array<i32>} : memref<8x1xf32, #tpu.memory_space<vmem>>, vector<8x1xf32>,
      %c0_17 = arith.constant 0 : index
      %c0_18 = arith.constant 0 : index
      %19 = vector.load %arg6[%c0_17, %c0_18] : memref<8x1xf32, #tpu.memory_space<vmem>>, vector<8x1xf32>
      %cst_19 = arith.constant 3.906250e-03 : f32
      %20 = vector.broadcast %cst_19 : f32 to vector<8x1xf32>
      %21 = arith.mulf %19, %20 : vector<8x1xf32>
      %c0_20 = arith.constant 0 : index
      %c0_21 = arith.constant 0 : index
      %22 = vector.load %arg4[%c0_20, %c0_21] : memref<8x1xf32, #tpu.memory_space<vmem>>, vector<8x1xf32>
      tpu.vector_store %arg4[%c0_20, %c0_21], %21 {strides = array<i32>} : memref<8x1xf32, #tpu.memory_space<vmem>>, vector<8x1xf32>,
    } else {
    }
    return
  }
  func.func @transform_0(%arg0: i32, %arg1: i32) -> (i32, i32) {
    %c0_i32 = arith.constant 0 : i32
    return %arg0, %arg1 : i32, i32
  }
  func.func @transform_1(%arg0: i32, %arg1: i32) -> (i32, i32) {
    %c0_i32 = arith.constant 0 : i32
    %c0_i32_0 = arith.constant 0 : i32
    return %arg0, %c0_i32 : i32, i32
  }
  func.func @transform_2(%arg0: i32, %arg1: i32) -> (i32, i32) {
    %c0_i32 = arith.constant 0 : i32
    %c0_i32_0 = arith.constant 0 : i32
    return %arg0, %c0_i32 : i32, i32
  }
}

</mosaic_0001>

<bundles_post_ra>
// kernel: tpu_custom_call.1
= control target key start
LH: loop header
LB: loop body
LE: loop exit
PB: predicated region body
PF: predicated region fallthrough
CT: control target
= control target key end

     0   :  { %8 = vsyncpa [#allocation5], 0  ;;  %s86_s9 = smov [#allocation4]   ;;  %s119_s0 = inlined_call_operand.hbm [shape: f32[8,256], index: 0, kind: input, shape index: {}]   ;;  %s120_s1 = inlined_call_operand.vmem [shape: f32[8,1], index: 1, kind: output, shape index: {0}]   ;;  %s121_s2 = inlined_call_operand.vmem [shape: f32[8,1], index: 2, kind: output, shape index: {1}]  }
   0x1   :  { %s15_s10 = sshll.u32 %s86_s9, 4  ;;  %s16_s10 = int_to_ptr.vmem [resolvable:$true] %s15_s10 }
   0x2   :  { %s72_s11 = scalar_lea.vmem %s16_s10, 256  ;;  %p77_p1 = scmp.lt.s32.totalorder %s16_s10, %s16_s10 }
   0x3   :  { %p73_p0 = scmp.ne.s32.totalorder %s16_s10, %s72_s11  ;;  %p78_p2 = scmp.lt.s32.totalorder %s72_s11, %s72_s11 }
   0x5   :  { %p79_p3 = por %p78_p2, %p77_p1 }
   0x7   :  { %p80_p4 = pnand %p79_p3, %p73_p0 }
   0x9   :  { %83 = shalt.err (!%p80_p4)
}
   0xa   :  { %18 = dma.hbm_to_vmem [thread:$0]  %s119_s0, 256, %s16_s10, [#allocation5]  }
   0xb   :  { %84 = dma.done.wait [#allocation5], 256  }
   0xc   :  { %85 = vsyncadd [#allocation5], 4294967040  ;;  %vm34_vm0 = vcmask 7168   ;;  %v87_v0 = vmov 0.0   ;;  %v22_v1 = vld [vmem:[#allocation4] sm:$0xff]  ;;  %v23_v2 = vld [vmem:[#allocation4 + $0x8] sm:$0xff] }
   0xd   :  { %36 = vst.msk [vmem:[#allocation3] sm:$0xff] %vm34_vm0, %v87_v0  ;;  %v27_v3 = vadd.f32 %v23_v2, %v22_v1  ;;  %v24_v4 = vmax.f32 %v22_v1, %v23_v2  ;;  %v88_v5 = vmov -inf  }
   0xe   :  { %35 = vst.msk [vmem:[#allocation2] sm:$0xff] %vm34_vm0, %v88_v5 }
   0xf   :  { %28 = vadd.xlane.f32.xlu0 %v27_v3 }
  0x13   :  { %25 = vmax.xlane.f32.xlu0 %v24_v4 }
  0x14   :  { %v41_v6 = vld [vmem:[#allocation3] sm:$0xff] }
  0x15   :  { %v37_v9 = vld [vmem:[#allocation2] sm:$0xff] }
  0x98   :  { %v29_v7 = vpop.xlane.xlu0 %28 }
  0x99   :  { %v42_v8 = vadd.f32 %v41_v6, %v29_v7 }
  0x9b   :  { %43 = vst.msk [vmem:[#allocation3] sm:$0xff] %vm34_vm0, %v42_v8 }
  0x9c   :  { %v26_v10 = vpop.xlane.xlu0 %25 }
  0x9d   :  { %v38_v11 = vmax.f32 %v37_v9, %v26_v10 }
  0x9f   :  { %40 = vst.msk [vmem:[#allocation2] sm:$0xff] %vm34_vm0, %v38_v11 }
  0xa2   :  { %v49_v12 = vld [vmem:[#allocation3] sm:$0xff] }
  0xa3   :  { %v50_v13 = vmul.f32 0.00390625, %v49_v12 }
  0xa5   :  { %51 = vst.msk [vmem:[%s121_s2] sm:$0xff] %vm34_vm0, %v50_v13 }
  0xa6   :  { %v47_v14 = vld [vmem:[#allocation2] sm:$0xff] }
  0xa7   :  { %48 = vst.msk [vmem:[%s120_s1] sm:$0xff] %vm34_vm0, %v47_v14 }
  0xa8   :  { %60 = vsyncpa [#allocation5], 1 }

</bundles_post_ra>
